<compile_context>
chip_gen: v7x
topology: tpu7x:2x2x1
jax: 0.10.0
libtpu: 0.0.40
codegen_flags: <defaults>
</compile_context>

<pallas_src>
import functools
import math

import jax
import jax.numpy as jnp
from jax.experimental import pallas as pl
from jax.experimental.pallas import tpu as pltpu

NUM_FREQ_CHANNELS = 256          # Timesteps(num_channels=256)
HALF = NUM_FREQ_CHANNELS // 2    # 128
LANE = 128
SUBLANE = 8


def _round_up(x, m):
    return ((x + m - 1) // m) * m


def _cdiv(a, b):
    return (a + b - 1) // b


def _is_v5_device():
    try:
        kind = jax.devices()[0].device_kind.lower()
        return "v5" in kind
    except Exception:
        return False


def _vmem_capacity_bytes():
    """Physical VMEM per core; conservative fallback = v7x's 64 MiB."""
    try:
        cap = getattr(pltpu.get_tpu_info(), "vmem_capacity_bytes", None)
        if cap:
            return int(cap)
    except Exception:
        pass
    return 64 << 20


def _timestep_encoder_kernel(t_ref, freq_ref, w1_ref, b1_ref, w2_ref, b2_ref,
                             o_ref, *, fuse_k256):
    # Per grid step:
    #   t_ref    (tile_b, 1)      f32 timesteps
    #   freq_ref (1, 128)         f32 frequency table
    #   w1_ref   (256, D_pad)     bf16  (rows [0:128] multiply cos, [128:256] sin)
    #   b1_ref   (1, D_pad)       f32
    #   w2_ref   (D_pad, D_pad)   bf16
    #   b2_ref   (1, D_pad)       f32
    #   o_ref    (tile_b, D_pad)  out_dtype
    t = t_ref[...]                       # (tile_b, 1)
    args = t * freq_ref[...]             # (tile_b, 128), lane broadcast of t

    # flip_sin_to_cos=True -> emb = [cos | sin]
    cos_e = jnp.cos(args).astype(jnp.bfloat16)
    sin_e = jnp.sin(args).astype(jnp.bfloat16)

    if fuse_k256:
        # v6e/v7x: one K=256 MXU push; the concat sits at a 128-lane boundary
        # so no cross-lane relayout is needed.
        emb = jnp.concatenate([cos_e, sin_e], axis=-1)        # (tile_b, 256)
        h = jnp.dot(emb, w1_ref[...], preferred_element_type=jnp.float32)
    else:
        # v5e: two K=128 pushes match the 128-deep MXU exactly.
        h = jnp.dot(cos_e, w1_ref[:HALF, :], preferred_element_type=jnp.float32)
        h = h + jnp.dot(sin_e, w1_ref[HALF:, :], preferred_element_type=jnp.float32)

    h = h + b1_ref[...]
    h = h * jax.nn.sigmoid(h)            # SiLU, kept in f32

    out = jnp.dot(h.astype(jnp.bfloat16), w2_ref[...],
                  preferred_element_type=jnp.float32)
    out = out + b2_ref[...]
    o_ref[...] = out.astype(o_ref.dtype)


def timestep_encoder(timesteps, w1, b1, w2, b2, *, max_tile_b=None,
                     out_dtype=jnp.float32):
    """timesteps: (B,) float/int array. w1:(256,D) b1:(D,) w2:(D,D) b2:(D,).

    Weights are stored as [in_features, out_features] (i.e. PyTorch weight.T).
    Returns (B, D) embedding in `out_dtype` matching the PyTorch module
    (f32 reference within bf16-matmul tolerance).
    """
    B = timesteps.shape[0]
    assert w1.shape[0] == NUM_FREQ_CHANNELS
    D = w1.shape[1]
    D_pad = _round_up(D, LANE)           # lane-dense output / weight columns

    is_v5 = _is_v5_device()
    if max_tile_b is None:
        # v6e/v7x MXU is 256 deep -> 256-row tiles halve the number of pushes
        # and grid-step overhead; v5e's 128-deep MXU is happy with 128.
        max_tile_b = 128 if is_v5 else 256
    fuse_k256 = not is_v5

    # Balanced batch tiling: split B into n equal sublane-aligned tiles so
    # padding waste is at most one sublane-group per tile (not a full tile).
    n_tiles = max(1, _cdiv(B, max_tile_b))
    tile_b = _round_up(_cdiv(B, n_tiles), SUBLANE)
    B_pad = n_tiles * tile_b
    grid = (n_tiles,)

    # ---- host-side layout plumbing (done once, outside the kernel) ----------
    t2d = jnp.pad(timesteps.astype(jnp.float32), (0, B_pad - B)).reshape(B_pad, 1)

    exponent = -math.log(10000.0) * jnp.arange(HALF, dtype=jnp.float32) / (HALF - 1.0)
    freqs = jnp.exp(exponent).reshape(1, HALF)

    w1p = jnp.pad(w1.astype(jnp.float32), ((0, 0), (0, D_pad - D))).astype(jnp.bfloat16)
    b1p = jnp.pad(b1.astype(jnp.float32), (0, D_pad - D)).reshape(1, D_pad)
    w2p = jnp.pad(w2.astype(jnp.float32),
                  ((0, D_pad - D), (0, D_pad - D))).astype(jnp.bfloat16)
    b2p = jnp.pad(b2.astype(jnp.float32), (0, D_pad - D)).reshape(1, D_pad)

    # ---- scheduler hints -----------------------------------------------------
    out_bytes = jnp.dtype(out_dtype).itemsize
    flops = 2 * B_pad * (NUM_FREQ_CHANNELS * D_pad + D_pad * D_pad)
    transcendentals = B_pad * (NUM_FREQ_CHANNELS + D_pad)        # sin/cos + sigmoid
    bytes_accessed = ((NUM_FREQ_CHANNELS * D_pad + D_pad * D_pad) * 2   # bf16 weights
                      + 2 * D_pad * 4 + HALF * 4                        # biases + freqs
                      + B_pad * 4 + B_pad * D_pad * out_bytes)          # t in, out
    cost = pl.CostEstimate(flops=flops, transcendentals=transcendentals,
                           bytes_accessed=bytes_accessed)

    kernel = functools.partial(_timestep_encoder_kernel, fuse_k256=fuse_k256)
    # Megacore sharding buys nothing on a single-tile grid; keep it serial.
    # (A D-column split of W2 across v7x's two TCs would halve per-TC weight
    #  DMA in the weight-bound regime; not implemented here.)
    dim_sem = ("arbitrary",) if n_tiles == 1 else ("parallel",)
    vmem_cap = _vmem_capacity_bytes()

    def _run(single_buffer):
        if single_buffer:
            # Constant-index blocks are fetched exactly once; a second buffer
            # is pure VMEM waste (W2 alone is D_pad^2 * 2 bytes).
            def const_spec(shape):
                return pl.BlockSpec(shape, lambda i: (0,) * len(shape),
                                    pipeline_mode=pl.Buffered(1))
            weight_copies = 1
        else:
            def const_spec(shape):
                return pl.BlockSpec(shape, lambda i: (0,) * len(shape))
            weight_copies = 2

        vmem_need = (
            weight_copies * (NUM_FREQ_CHANNELS * D_pad + D_pad * D_pad) * 2  # bf16 weights
            + weight_copies * (2 * SUBLANE * D_pad * 4 + SUBLANE * HALF * 4)  # biases+freqs
            + 2 * tile_b * LANE * 4                    # timestep tile (double-buffered)
            + 2 * tile_b * D_pad * out_bytes           # output tile (double-buffered)
        ) + (2 << 20)
        # Generation-aware budget: stay below physical VMEM with headroom for
        # Mosaic internal scratch/semaphores (~12 MiB).
        vmem_limit = int(max(4 << 20, min(vmem_need, vmem_cap - (12 << 20))))

        return pl.pallas_call(
            kernel,
            out_shape=jax.ShapeDtypeStruct((B_pad, D_pad), out_dtype),
            grid=grid,
            in_specs=[
                pl.BlockSpec((tile_b, 1), lambda i: (i, 0)),    # timesteps
                const_spec((1, HALF)),                          # freqs
                const_spec((NUM_FREQ_CHANNELS, D_pad)),         # W1
                const_spec((1, D_pad)),                         # b1
                const_spec((D_pad, D_pad)),                     # W2
                const_spec((1, D_pad)),                         # b2
            ],
            out_specs=pl.BlockSpec((tile_b, D_pad), lambda i: (i, 0)),
            compiler_params=pltpu.CompilerParams(
                dimension_semantics=dim_sem,
                vmem_limit_bytes=vmem_limit),
            cost_estimate=cost,
        )(t2d, freqs, w1p, b1p, w2p, b2p)

    try:
        out = _run(single_buffer=True)
    except Exception:
        # Fallback for Pallas versions that reject pipeline_mode=Buffered(1);
        # default double-buffering is correct, just uses more VMEM.
        out = _run(single_buffer=False)

    return out[:B, :D]


def timestep_encoder_ref(timesteps, w1, b1, w2, b2):
    """Pure-JAX f32 reference matching the PyTorch module."""
    exponent = -math.log(10000.0) * jnp.arange(HALF, dtype=jnp.float32) / (HALF - 1.0)
    freqs = jnp.exp(exponent)
    args = timesteps.astype(jnp.float32)[:, None] * freqs[None, :]
    emb = jnp.concatenate([jnp.cos(args), jnp.sin(args)], axis=-1)
    h = emb @ w1 + b1
    h = h * jax.nn.sigmoid(h)
    return h @ w2 + b2


if __name__ == "__main__":
    key = jax.random.PRNGKey(0)

    # Configs: lane-dense D (128), a non-multiple-of-128 D (32) with bf16
    # output, and a multi-tile batch exercising balanced tiling + "parallel".
    configs = (
        (128, 2, jnp.float32),
        (32, 3, jnp.bfloat16),
        (64, 260, jnp.float32),
    )
    for embedding_dim, batch, out_dtype in configs:
        key, k_t, k_w1, k_b1, k_w2, k_b2 = jax.random.split(key, 6)

        # Shapes from the module __init__ (weights stored as [in, out] = torch W.T):
        #   linear_1: Linear(256, D) -> w1 (256, D), b1 (D,)
        #   linear_2: Linear(D, D)   -> w2 (D, D),  b2 (D,)
        w1 = jax.random.normal(k_w1, (NUM_FREQ_CHANNELS, embedding_dim), jnp.float32) * 0.02
        b1 = jax.random.normal(k_b1, (embedding_dim,), jnp.float32) * 0.02
        w2 = jax.random.normal(k_w2, (embedding_dim, embedding_dim), jnp.float32) * 0.02
        b2 = jax.random.normal(k_b2, (embedding_dim,), jnp.float32) * 0.02

        # Example diffusion timesteps.
        timesteps = jax.random.randint(k_t, (batch,), 0, 1000).astype(jnp.float32)

        out = jax.block_until_ready(
            timestep_encoder(timesteps, w1, b1, w2, b2, out_dtype=out_dtype))
        ref = timestep_encoder_ref(timesteps, w1, b1, w2, b2)

        assert out.shape == (batch, embedding_dim)
        assert out.dtype == out_dtype
        # bf16 MXU operands (and possibly bf16 output) vs. f32 reference.
        assert jnp.allclose(out.astype(jnp.float32), ref, atol=2e-2, rtol=2e-2), \
            "mismatch vs reference"

    print("KERNEL_OK")
</pallas_src>

<mosaic_0001>
module attributes {stable_mosaic.version = 11 : i64} {
  func.func @_timestep_encoder_kernel(%arg0: i32, %arg1: memref<8x1xf32, #tpu.memory_space<vmem>>, %arg2: memref<1x128xf32, #tpu.memory_space<vmem>>, %arg3: memref<256x128xbf16, #tpu.memory_space<vmem>>, %arg4: memref<1x128xf32, #tpu.memory_space<vmem>>, %arg5: memref<128x128xbf16, #tpu.memory_space<vmem>>, %arg6: memref<1x128xf32, #tpu.memory_space<vmem>>, %arg7: memref<8x128xf32, #tpu.memory_space<vmem>>) attributes {dimension_semantics = [#tpu.dimension_semantics<arbitrary>], iteration_bounds = array<i64: 1>, scalar_prefetch = 0 : i64, scratch_operands = 0 : i64, tpu.core_type = #tpu.core_type<tc>, window_params = [{transform_indices = @transform_0, window_bounds = array<i64: 8, 1>}, {pipeline_mode = #tpu.pipeline_mode<synchronous>, transform_indices = @transform_1, window_bounds = array<i64: 1, 128>}, {pipeline_mode = #tpu.pipeline_mode<synchronous>, transform_indices = @transform_2, window_bounds = array<i64: 256, 128>}, {pipeline_mode = #tpu.pipeline_mode<synchronous>, transform_indices = @transform_3, window_bounds = array<i64: 1, 128>}, {pipeline_mode = #tpu.pipeline_mode<synchronous>, transform_indices = @transform_4, window_bounds = array<i64: 128, 128>}, {pipeline_mode = #tpu.pipeline_mode<synchronous>, transform_indices = @transform_5, window_bounds = array<i64: 1, 128>}, {transform_indices = @transform_6, window_bounds = array<i64: 8, 128>}]} {
    %c0 = arith.constant 0 : index
    %c0_0 = arith.constant 0 : index
    %0 = vector.load %arg1[%c0, %c0_0] : memref<8x1xf32, #tpu.memory_space<vmem>>, vector<8x1xf32>
    %c0_1 = arith.constant 0 : index
    %c0_2 = arith.constant 0 : index
    %1 = vector.load %arg2[%c0_1, %c0_2] : memref<1x128xf32, #tpu.memory_space<vmem>>, vector<1x128xf32>
    %2 = vector.broadcast %0 : vector<8x1xf32> to vector<8x128xf32>
    %3 = vector.broadcast %1 : vector<1x128xf32> to vector<8x128xf32>
    %4 = arith.mulf %2, %3 : vector<8x128xf32>
    %5 = math.cos %4 : vector<8x128xf32>
    %6 = arith.truncf %5 : vector<8x128xf32> to vector<8x128xbf16>
    %7 = math.sin %4 : vector<8x128xf32>
    %8 = arith.truncf %7 : vector<8x128xf32> to vector<8x128xbf16>
    %9 = tpu.concatenate %6, %8 in 1 : vector<8x128xbf16>, vector<8x128xbf16> -> vector<8x256xbf16>
    %c0_3 = arith.constant 0 : index
    %c0_4 = arith.constant 0 : index
    %10 = vector.load %arg3[%c0_3, %c0_4] : memref<256x128xbf16, #tpu.memory_space<vmem>>, vector<256x128xbf16>
    %cst = arith.constant dense<0.000000e+00> : vector<8x128xf32>
    %11 = tpu.matmul %9, %10, %cst {dimension_numbers = #tpu.dot_dimension_numbers<[1], [0], [0], [1], [0, 0, 1, 1], [], []>} : vector<8x256xbf16>, vector<256x128xbf16>, vector<8x128xf32> -> vector<8x128xf32>
    %c0_5 = arith.constant 0 : index
    %c0_6 = arith.constant 0 : index
    %12 = vector.load %arg4[%c0_5, %c0_6] : memref<1x128xf32, #tpu.memory_space<vmem>>, vector<1x128xf32>
    %13 = vector.broadcast %12 : vector<1x128xf32> to vector<8x128xf32>
    %14 = arith.addf %11, %13 : vector<8x128xf32>
    %15 = arith.negf %14 : vector<8x128xf32>
    %16 = math.exp %15 : vector<8x128xf32>
    %cst_7 = arith.constant 1.000000e+00 : f32
    %17 = vector.broadcast %cst_7 : f32 to vector<8x128xf32>
    %18 = arith.addf %17, %16 : vector<8x128xf32>
    %19 = arith.divf %17, %18 : vector<8x128xf32>
    %20 = arith.mulf %14, %19 : vector<8x128xf32>
    %21 = arith.truncf %20 : vector<8x128xf32> to vector<8x128xbf16>
    %c0_8 = arith.constant 0 : index
    %c0_9 = arith.constant 0 : index
    %22 = vector.load %arg5[%c0_8, %c0_9] : memref<128x128xbf16, #tpu.memory_space<vmem>>, vector<128x128xbf16>
    %cst_10 = arith.constant dense<0.000000e+00> : vector<8x128xf32>
    %23 = tpu.matmul %21, %22, %cst_10 {dimension_numbers = #tpu.dot_dimension_numbers<[1], [0], [0], [1], [0, 0, 1, 1], [], []>} : vector<8x128xbf16>, vector<128x128xbf16>, vector<8x128xf32> -> vector<8x128xf32>
    %c0_11 = arith.constant 0 : index
    %c0_12 = arith.constant 0 : index
    %24 = vector.load %arg6[%c0_11, %c0_12] : memref<1x128xf32, #tpu.memory_space<vmem>>, vector<1x128xf32>
    %25 = vector.broadcast %24 : vector<1x128xf32> to vector<8x128xf32>
    %26 = arith.addf %23, %25 : vector<8x128xf32>
    %c0_13 = arith.constant 0 : index
    %c0_14 = arith.constant 0 : index
    %27 = vector.load %arg7[%c0_13, %c0_14] : memref<8x128xf32, #tpu.memory_space<vmem>>, vector<8x128xf32>
    tpu.vector_store %arg7[%c0_13, %c0_14], %26 {strides = array<i32>} : memref<8x128xf32, #tpu.memory_space<vmem>>, vector<8x128xf32>,
    return
  }
  func.func @transform_0(%arg0: i32) -> (i32, i32) {
    %c0_i32 = arith.constant 0 : i32
    %c0_i32_0 = arith.constant 0 : i32
    return %arg0, %c0_i32 : i32, i32
  }
  func.func @transform_1(%arg0: i32) -> (i32, i32) {
    %c0_i32 = arith.constant 0 : i32
    %c0_i32_0 = arith.constant 0 : i32
    %c0_i32_1 = arith.constant 0 : i32
    return %c0_i32, %c0_i32_0 : i32, i32
  }
  func.func @transform_2(%arg0: i32) -> (i32, i32) {
    %c0_i32 = arith.constant 0 : i32
    %c0_i32_0 = arith.constant 0 : i32
    %c0_i32_1 = arith.constant 0 : i32
    return %c0_i32, %c0_i32_0 : i32, i32
  }
  func.func @transform_3(%arg0: i32) -> (i32, i32) {
    %c0_i32 = arith.constant 0 : i32
    %c0_i32_0 = arith.constant 0 : i32
    %c0_i32_1 = arith.constant 0 : i32
    return %c0_i32, %c0_i32_0 : i32, i32
  }
  func.func @transform_4(%arg0: i32) -> (i32, i32) {
    %c0_i32 = arith.constant 0 : i32
    %c0_i32_0 = arith.constant 0 : i32
    %c0_i32_1 = arith.constant 0 : i32
    return %c0_i32, %c0_i32_0 : i32, i32
  }
  func.func @transform_5(%arg0: i32) -> (i32, i32) {
    %c0_i32 = arith.constant 0 : i32
    %c0_i32_0 = arith.constant 0 : i32
    %c0_i32_1 = arith.constant 0 : i32
    return %c0_i32, %c0_i32_0 : i32, i32
  }
  func.func @transform_6(%arg0: i32) -> (i32, i32) {
    %c0_i32 = arith.constant 0 : i32
    %c0_i32_0 = arith.constant 0 : i32
    return %arg0, %c0_i32 : i32, i32
  }
}

module attributes {stable_mosaic.version = 11 : i64} {
  func.func @_timestep_encoder_kernel(%arg0: i32, %arg1: memref<8x1xf32, #tpu.memory_space<vmem>>, %arg2: memref<1x128xf32, #tpu.memory_space<vmem>>, %arg3: memref<256x128xbf16, #tpu.memory_space<vmem>>, %arg4: memref<1x128xf32, #tpu.memory_space<vmem>>, %arg5: memref<128x128xbf16, #tpu.memory_space<vmem>>, %arg6: memref<1x128xf32, #tpu.memory_space<vmem>>, %arg7: memref<8x128xf32, #tpu.memory_space<vmem>>) attributes {dimension_semantics = [#tpu.dimension_semantics<arbitrary>], iteration_bounds = array<i64: 1>, scalar_prefetch = 0 : i64, scratch_operands = 0 : i64, tpu.core_type = #tpu.core_type<tc>, window_params = [{transform_indices = @transform_0, window_bounds = array<i64: 8, 1>}, {pipeline_mode = #tpu.pipeline_mode<synchronous>, transform_indices = @transform_1, window_bounds = array<i64: 1, 128>}, {pipeline_mode = #tpu.pipeline_mode<synchronous>, transform_indices = @transform_2, window_bounds = array<i64: 256, 128>}, {pipeline_mode = #tpu.pipeline_mode<synchronous>, transform_indices = @transform_3, window_bounds = array<i64: 1, 128>}, {pipeline_mode = #tpu.pipeline_mode<synchronous>, transform_indices = @transform_4, window_bounds = array<i64: 128, 128>}, {pipeline_mode = #tpu.pipeline_mode<synchronous>, transform_indices = @transform_5, window_bounds = array<i64: 1, 128>}, {transform_indices = @transform_6, window_bounds = array<i64: 8, 128>}]} {
    %c0 = arith.constant 0 : index
    %c0_0 = arith.constant 0 : index
    %0 = vector.load %arg1[%c0, %c0_0] : memref<8x1xf32, #tpu.memory_space<vmem>>, vector<8x1xf32>
    %c0_1 = arith.constant 0 : index
    %c0_2 = arith.constant 0 : index
    %1 = vector.load %arg2[%c0_1, %c0_2] : memref<1x128xf32, #tpu.memory_space<vmem>>, vector<1x128xf32>
    %2 = vector.broadcast %0 : vector<8x1xf32> to vector<8x128xf32>
    %3 = vector.broadcast %1 : vector<1x128xf32> to vector<8x128xf32>
    %4 = arith.mulf %2, %3 : vector<8x128xf32>
    %5 = math.cos %4 : vector<8x128xf32>
    %6 = arith.truncf %5 : vector<8x128xf32> to vector<8x128xbf16>
    %7 = math.sin %4 : vector<8x128xf32>
    %8 = arith.truncf %7 : vector<8x128xf32> to vector<8x128xbf16>
    %9 = tpu.concatenate %6, %8 in 1 : vector<8x128xbf16>, vector<8x128xbf16> -> vector<8x256xbf16>
    %c0_3 = arith.constant 0 : index
    %c0_4 = arith.constant 0 : index
    %10 = vector.load %arg3[%c0_3, %c0_4] : memref<256x128xbf16, #tpu.memory_space<vmem>>, vector<256x128xbf16>
    %cst = arith.constant dense<0.000000e+00> : vector<8x128xf32>
    %11 = tpu.matmul %9, %10, %cst {dimension_numbers = #tpu.dot_dimension_numbers<[1], [0], [0], [1], [0, 0, 1, 1], [], []>} : vector<8x256xbf16>, vector<256x128xbf16>, vector<8x128xf32> -> vector<8x128xf32>
    %c0_5 = arith.constant 0 : index
    %c0_6 = arith.constant 0 : index
    %12 = vector.load %arg4[%c0_5, %c0_6] : memref<1x128xf32, #tpu.memory_space<vmem>>, vector<1x128xf32>
    %13 = vector.broadcast %12 : vector<1x128xf32> to vector<8x128xf32>
    %14 = arith.addf %11, %13 : vector<8x128xf32>
    %15 = arith.negf %14 : vector<8x128xf32>
    %16 = math.exp %15 : vector<8x128xf32>
    %cst_7 = arith.constant 1.000000e+00 : f32
    %17 = vector.broadcast %cst_7 : f32 to vector<8x128xf32>
    %18 = arith.addf %17, %16 : vector<8x128xf32>
    %19 = arith.divf %17, %18 : vector<8x128xf32>
    %20 = arith.mulf %14, %19 : vector<8x128xf32>
    %21 = arith.truncf %20 : vector<8x128xf32> to vector<8x128xbf16>
    %c0_8 = arith.constant 0 : index
    %c0_9 = arith.constant 0 : index
    %22 = vector.load %arg5[%c0_8, %c0_9] : memref<128x128xbf16, #tpu.memory_space<vmem>>, vector<128x128xbf16>
    %cst_10 = arith.constant dense<0.000000e+00> : vector<8x128xf32>
    %23 = tpu.matmul %21, %22, %cst_10 {dimension_numbers = #tpu.dot_dimension_numbers<[1], [0], [0], [1], [0, 0, 1, 1], [], []>} : vector<8x128xbf16>, vector<128x128xbf16>, vector<8x128xf32> -> vector<8x128xf32>
    %c0_11 = arith.constant 0 : index
    %c0_12 = arith.constant 0 : index
    %24 = vector.load %arg6[%c0_11, %c0_12] : memref<1x128xf32, #tpu.memory_space<vmem>>, vector<1x128xf32>
    %25 = vector.broadcast %24 : vector<1x128xf32> to vector<8x128xf32>
    %26 = arith.addf %23, %25 : vector<8x128xf32>
    %c0_13 = arith.constant 0 : index
    %c0_14 = arith.constant 0 : index
    %27 = vector.load %arg7[%c0_13, %c0_14] : memref<8x128xf32, #tpu.memory_space<vmem>>, vector<8x128xf32>
    tpu.vector_store %arg7[%c0_13, %c0_14], %26 {strides = array<i32>} : memref<8x128xf32, #tpu.memory_space<vmem>>, vector<8x128xf32>,
    return
  }
  func.func @transform_0(%arg0: i32) -> (i32, i32) {
    %c0_i32 = arith.constant 0 : i32
    %c0_i32_0 = arith.constant 0 : i32
    return %arg0, %c0_i32 : i32, i32
  }
  func.func @transform_1(%arg0: i32) -> (i32, i32) {
    %c0_i32 = arith.constant 0 : i32
    %c0_i32_0 = arith.constant 0 : i32
    %c0_i32_1 = arith.constant 0 : i32
    return %c0_i32, %c0_i32_0 : i32, i32
  }
  func.func @transform_2(%arg0: i32) -> (i32, i32) {
    %c0_i32 = arith.constant 0 : i32
    %c0_i32_0 = arith.constant 0 : i32
    %c0_i32_1 = arith.constant 0 : i32
    return %c0_i32, %c0_i32_0 : i32, i32
  }
  func.func @transform_3(%arg0: i32) -> (i32, i32) {
    %c0_i32 = arith.constant 0 : i32
    %c0_i32_0 = arith.constant 0 : i32
    %c0_i32_1 = arith.constant 0 : i32
    return %c0_i32, %c0_i32_0 : i32, i32
  }
  func.func @transform_4(%arg0: i32) -> (i32, i32) {
    %c0_i32 = arith.constant 0 : i32
    %c0_i32_0 = arith.constant 0 : i32
    %c0_i32_1 = arith.constant 0 : i32
    return %c0_i32, %c0_i32_0 : i32, i32
  }
  func.func @transform_5(%arg0: i32) -> (i32, i32) {
    %c0_i32 = arith.constant 0 : i32
    %c0_i32_0 = arith.constant 0 : i32
    %c0_i32_1 = arith.constant 0 : i32
    return %c0_i32, %c0_i32_0 : i32, i32
  }
  func.func @transform_6(%arg0: i32) -> (i32, i32) {
    %c0_i32 = arith.constant 0 : i32
    %c0_i32_0 = arith.constant 0 : i32
    return %arg0, %c0_i32 : i32, i32
  }
}

</mosaic_0001>

<bundles_post_ra>
// kernel: tpu_custom_call.1
= control target key start
LH: loop header
LB: loop body
LE: loop exit
PB: predicated region body
PF: predicated region fallthrough
CT: control target
= control target key end

     0   :  { %11 = vsyncpa [#allocation3], 0  ;;  %s915_s0 = inlined_call_operand.vmem [shape: f32[8,1], index: 0, kind: input, shape index: {}]   ;;  %s916_s1 = inlined_call_operand.vmem [shape: f32[1,128], index: 1, kind: input, shape index: {}]   ;;  %s917_s2 = inlined_call_operand.hbm [shape: bf16[256,128], index: 2, kind: input, shape index: {}]   ;;  %s918_s3 = inlined_call_operand.vmem [shape: f32[1,128], index: 3, kind: input, shape index: {}]   ;;  %s919_s4 = inlined_call_operand.hbm [shape: bf16[128,128], index: 4, kind: input, shape index: {}]   ;;  %s920_s5 = inlined_call_operand.vmem [shape: f32[1,128], index: 5, kind: input, shape index: {}]   ;;  %s921_s6 = inlined_call_operand.hbm [shape: f32[8,128], index: 6, kind: output, shape index: {}]  }
   0x1   :  { %12 = vsyncpa [#allocation6], 0 }
   0x2   :  { %13 = vsyncpa [#allocation4], 0  ;;  %s797_s21 = smov [#allocation2]   ;;  %s725_s25 = scalar_lea.hbm %s917_s2, 2048 }
   0x3   :  { %s23_s22 = sshll.u32 %s797_s21, 4  ;;  %p726_p0 = scmp.ne.s32.totalorder %s917_s2, %s725_s25  ;;  %s24_s22 = int_to_ptr.vmem [resolvable:$true] %s23_s22 }
   0x4   :  { %p729_p1 = scmp.lt.u32.totalorder %s725_s25, %s917_s2 }
   0x6   :  { %p731_p2 = pnand %p729_p1, %p726_p0 }
   0x8   :  { %734 = shalt.err (!%p731_p2)
}
   0x9   :  { %s735_s30 = scalar_lea.vmem %s24_s22, 2048  ;;  %p740_p4 = scmp.lt.s32.totalorder %s24_s22, %s24_s22 }
   0xa   :  { %p736_p3 = scmp.ne.s32.totalorder %s24_s22, %s735_s30  ;;  %p741_p5 = scmp.lt.s32.totalorder %s735_s30, %s735_s30 }
   0xc   :  { %p742_p6 = por %p741_p5, %p740_p4 }
   0xe   :  { %p743_p7 = pnand %p742_p6, %p736_p3 }
  0x10   :  { %746 = shalt.err (!%p743_p7)
}
  0x11   :  { %s798_s7 = smov 64   ;;  %s799_s8 = smov 4  }
  0x12   :  { %29 = dma.hbm_to_vmem [thread:$0]  %s917_s2, 2048, %s24_s22, [#allocation3], %s798_s7, %s798_s7, %s799_s8  }
  0x13   :  { %s800_s11 = smov [#allocation5]   ;;  %s747_s15 = scalar_lea.hbm %s919_s4, 1024 }
  0x14   :  { %s37_s12 = sshll.u32 %s800_s11, 4  ;;  %p748_p8 = scmp.ne.s32.totalorder %s919_s4, %s747_s15  ;;  %s38_s12 = int_to_ptr.vmem [resolvable:$true] %s37_s12 }
  0x15   :  { %p751_p9 = scmp.lt.u32.totalorder %s747_s15, %s919_s4 }
  0x17   :  { %p753_p10 = pnand %p751_p9, %p748_p8 }
  0x19   :  { %756 = shalt.err (!%p753_p10)
}
  0x1a   :  { %s757_s20 = scalar_lea.vmem %s38_s12, 1024  ;;  %p762_p12 = scmp.lt.s32.totalorder %s38_s12, %s38_s12 }
  0x1b   :  { %p758_p11 = scmp.ne.s32.totalorder %s38_s12, %s757_s20  ;;  %p763_p13 = scmp.lt.s32.totalorder %s757_s20, %s757_s20 }
  0x1d   :  { %p764_p0 = por %p763_p13, %p762_p12 }
  0x1f   :  { %p765_p1 = pnand %p764_p0, %p758_p11 }
  0x21   :  { %768 = shalt.err (!%p765_p1)
}
  0x22   :  { %43 = dma.hbm_to_vmem [thread:$0]  %s919_s4, 1024, %s38_s12, [#allocation6], %s798_s7, %s798_s7, %s799_s8  }
  0x23   :  { %791 = dma.done.wait [#allocation3], 2048  }
  0x24   :  { %792 = vsyncadd [#allocation3], 4294965248 }
  0x25   :  { %793 = dma.done.wait [#allocation6], 1024  }
  0x26   :  { %794 = vsyncadd [#allocation6], 4294966272  ;;  %v801_v0 = vmov 0   ;;  %v53_v1 = vld [vmem:[%s915_s0] sm:$0xff]  ;;  %v695_v4 = vld [vmem:[#allocation2 + $0x48] sm:$0xff]   ;;  %s810_s27 = smov [#allocation7]  }
  0x27   :  { %692 = vset.pattern.permute.xlu0 %v801_v0  ;;  %v693_v2 = vld [vmem:[#allocation2 + $0x40] sm:$0xff]   ;;  %v696_v5 = vld [vmem:[#allocation2 + $0x8] sm:$0xff]   ;;  %v697_v6 = vld [vmem:[#allocation2 + $0x50] sm:$0xff]   ;;  %v802_v32 = vmov 2102212464  }
  0x28   :  { %57 = vperm.xlu0 %692, %v53_v1   ;;  %v694_v3 = vld [vmem:[#allocation2] sm:$0xff]   ;;  %623 = vmatprep.subr.bf16.mxu0 %v693_v2  ;;  %v698_v7 = vld [vmem:[#allocation2 + $0x10] sm:$0xff]   ;;  %v699_v8 = vld [vmem:[#allocation2 + $0x58] sm:$0xff]   ;;  %v803_v34 = vmov 920167782  }
  0x29   :  { %624 = vmatpush3.bf16.msra.mxu0 %v694_v3  ;;  %v700_v9 = vld [vmem:[#allocation2 + $0x18] sm:$0xff]   ;;  %v701_v10 = vld [vmem:[#allocation2 + $0x60] sm:$0xff]   ;;  %v703_v12 = vld [vmem:[#allocation2 + $0x68] sm:$0xff]   ;;  %v804_v38 = vmov 1326507024  }
  0x2a   :  { %625 = vmatprep.subr.bf16.mxu0 %v695_v4  ;;  %v702_v11 = vld [vmem:[#allocation2 + $0x20] sm:$0xff]   ;;  %v704_v13 = vld [vmem:[#allocation2 + $0x28] sm:$0xff]   ;;  %v705_v14 = vld [vmem:[#allocation2 + $0x70] sm:$0xff]   ;;  %v805_v40 = vmov 683565275  }
  0x2b   :  { %v706_v15 = vld [vmem:[#allocation2 + $0x30] sm:$0xff]   ;;  %v707_v16 = vld [vmem:[#allocation2 + $0x78] sm:$0xff]   ;;  %v587_v18 = vld [vmem:[%s916_s1] ss:$0 sm:$0xff]  ;;  %v806_v42 = vmov 2475754826  }
  0x2c   :  { %v708_v17 = vld [vmem:[#allocation2 + $0x38] sm:$0xff]   ;;  %v807_v45 = vmov 2131351028  }
  0x2d   :  { %626 = vmatpush3.bf16.msra.mxu0 %v696_v5 }
  0x2e   :  { %627 = vmatprep.subr.bf16.mxu0 %v697_v6 }
  0x31   :  { %628 = vmatpush3.bf16.msra.mxu0 %v698_v7 }
  0x32   :  { %629 = vmatprep.subr.bf16.mxu0 %v699_v8 }
  0x35   :  { %630 = vmatpush3.bf16.msra.mxu0 %v700_v9 }
  0x36   :  { %631 = vmatprep.subr.bf16.mxu0 %v701_v10 }
  0x39   :  { %632 = vmatpush3.bf16.msra.mxu0 %v702_v11 }
  0x3a   :  { %633 = vmatprep.subr.bf16.mxu0 %v703_v12 }
  0x3d   :  { %634 = vmatpush3.bf16.msra.mxu0 %v704_v13 }
  0x3e   :  { %635 = vmatprep.subr.bf16.mxu0 %v705_v14 }
  0x41   :  { %636 = vmatpush3.bf16.msra.mxu0 %v706_v15 }
  0x42   :  { %637 = vmatprep.subr.bf16.mxu0 %v707_v16 }
  0x45   :  { %638 = vmatpush3.bf16.msra.mxu0 %v708_v17 }
  0xa7   :  { %v58_v19 = vpop.permute.xlu0 %57 }
  0xa8   :  { %v876_v20 = vmul.f32 %v587_v18, %v58_v19 }
  0xaa   :  { %v70_v21 = vand.u32 2139095040, %v876_v20  ;;  %v67_v22 = vand.u32 2147483647, %v876_v20  ;;  %vm69_vm7 = vcmp.lt.s32.totalorder %v876_v20, 0  ;;  %vm159_vm15 = vweird.f32 %v876_v20 }
  0xac   :  { %v71_v23 = vshrl.u32 %v70_v21, 23  ;;  %v74_v25 = vand.u32 8388607, %v67_v22  ;;  %vm68_vm8 = vcmp.le.f32.partialorder %v67_v22, 0.7853982 }
  0xae   :  { %v588_v24 = vadd.s32 4294967169, %v71_v23  ;;  %v75_v28 = vor.u32 8388608, %v74_v25 }
  0xb0   :  { %v77_v26 = vadd.s32 1, %v588_v24  ;;  %v115_v36 = vshll.u32 %v75_v28, 8 }
  0xb2   :  { %vm78_vm0 = vcmp.gt.s32.totalorder %v77_v26, 0 }
  0xb3   :  { %v79_v27 = vsel %vm78_vm0, %v77_v26, 0  ;;  %vm809_vm0 = vmmov 0  }
  0xb4   :  { %v81_v29 = vand.u32 31, %v79_v27  ;;  %v80_v30 = vshrl.u32 %v79_v27, 5 }
  0xb6   :  { %v82_v31 = vsub.s32 32, %v81_v29  ;;  %v93_v33 = vshll.u32 %v802_v32, %v81_v29  ;;  %v96_v35 = vshll.u32 %v803_v34, %v81_v29  ;;  %v84_v41 = vshll.u32 %v805_v40, %v81_v29 }
  0xb7   :  { %v87_v44 = vshll.u32 %v806_v42, %v81_v29  ;;  %v90_v47 = vshll.u32 %v807_v45, %v81_v29  ;;  %vm102_vm1 = vcmp.lt.s32.totalorder %v80_v30, 4  ;;  %vm99_vm2 = vcmp.lt.s32.totalorder %v80_v30, 1 }
  0xb8   :  { %v94_v37 = vshrl.u32 %v803_v34, %v82_v31  ;;  %v97_v39 = vshrl.u32 %v804_v38, %v82_v31  ;;  %v85_v43 = vshrl.u32 %v806_v42, %v82_v31  ;;  %v88_v46 = vshrl.u32 %v807_v45, %v82_v31 }
  0xb9   :  { %v91_v48 = vshrl.u32 %v802_v32, %v82_v31  ;;  %v83_v52 = vshrl.u32 %v805_v40, %v82_v31  ;;  %vm100_vm3 = vcmp.lt.s32.totalorder %v80_v30, 2  ;;  %vm101_vm4 = vcmp.lt.s32.totalorder %v80_v30, 3 }
  0xba   :  { %v95_v49 = vor.u32 %v94_v37, %v93_v33  ;;  %v98_v50 = vor.u32 %v97_v39, %v96_v35  ;;  %v86_v51 = vor.u32 %v85_v43, %v84_v41  ;;  %v89_v53 = vor.u32 %v88_v46, %v87_v44 }
  0xbb   :  { %v92_v54 = vor.u32 %v91_v48, %v90_v47 }
  0xbc   :  { %v108_v55 = vsel %vm102_vm1, %v95_v49, 920167782  ;;  %v112_v56 = vsel %vm102_vm1, %v98_v50, 1326507024  ;;  %v107_v58 = vsel %vm99_vm2, %v86_v51, %v89_v53  ;;  %v103_v61 = vsel %vm99_vm2, %v83_v52, %v86_v51 }
  0xbd   :  { %v104_v57 = vsel %vm102_vm1, %v92_v54, 2102212464  ;;  %v109_v59 = vsel %vm101_vm4, %v92_v54, %v108_v55  ;;  %v111_v60 = vsel %vm99_vm2, %v89_v53, %v92_v54  ;;  %v113_v0 = vsel %vm101_vm4, %v95_v49, %v112_v56  ;;  %v709_v56 = vld [vmem:[#allocation5] sm:$0xff]  }
  0xbe   :  { %v105_v62 = vsel %vm101_vm4, %v89_v53, %v104_v57  ;;  %v110_v63 = vsel %vm100_vm3, %v107_v58, %v109_v59  ;;  %v114_v1 = vsel %vm100_vm3, %v111_v60, %v113_v0  ;;  %v808_v57 = vmov 0.0   ;;  %v710_v58 = vld [vmem:[#allocation5 + $0x8] sm:$0xff]   ;;  %v711_v59 = vld [vmem:[#allocation5 + $0x10] sm:$0xff]   ;;  %v713_v60 = vld [vmem:[#allocation5 + $0x20] sm:$0xff]  }
  0xbf   :  { %v882_v2 = vmul.u32.u64.low %v115_v36, %v110_v63  ;;  %v883_v3 = vmul.u32.u64.high %v115_v36, %v110_v63, %v882_v2  ;;  %v885_v4 = vmul.u32.u64.low %v115_v36, %v114_v1  ;;  %v886_v5 = vmul.u32.u64.high %v115_v36, %v114_v1, %v885_v4  ;;  %654 = vmatprep.subr.bf16.mxu1 %v808_v57  ;;  %670 = vmatprep.mubr.msk.bf16.mxu1 %vm809_vm0, %v808_v57  ;;  %v716_v63 = vld [vmem:[#allocation5 + $0x38] sm:$0xff]   ;;  %v596_v1 = vld [vmem:[%s918_s3] ss:$0 sm:$0xff]  ;;  %s577_s3 = sshll.u32 %s810_s27, 4  ;;  %s578_s3 = int_to_ptr.vmem [resolvable:$true] %s577_s3 }
  0xc0   :  { %v106_v6 = vsel %vm100_vm3, %v103_v61, %v105_v62  ;;  %655 = vmatpush3.bf16.msra.mxu1 %v709_v56  ;;  %v714_v61 = vld [vmem:[#allocation5 + $0x28] sm:$0xff]   ;;  %v715_v62 = vld [vmem:[#allocation5 + $0x30] sm:$0xff]   ;;  %s769_s28 = scalar_lea.vmem %s578_s3, 128  ;;  %p774_p3 = scmp.lt.s32.totalorder %s578_s3, %s578_s3 }
  0xc1   :  { %v125_v7 = vadd.s32 1, %v883_v3  ;;  %v122_v8 = vmul.u32 %v115_v36, %v106_v6  ;;  %vm124_vm5 = vc.u32 %v886_v5, %v882_v2  ;;  %v123_v21 = vadd.s32 %v882_v2, %v886_v5  ;;  %656 = vmatprep.subr.bf16.mxu1 %v808_v57  ;;  %p770_p2 = scmp.ne.s32.totalorder %s578_s3, %s769_s28  ;;  %p775_p4 = scmp.lt.s32.totalorder %s769_s28, %s769_s28 }
  0xc3   :  { %v126_v9 = vsel %vm124_vm5, %v125_v7, %v883_v3  ;;  %p776_p5 = por %p775_p4, %p774_p3 }
  0xc4   :  { %v127_v10 = vadd.s32 %v126_v9, %v122_v8  ;;  %657 = vmatpush3.bf16.msra.mxu1 %v710_v58 }
  0xc5   :  { %658 = vmatprep.subr.bf16.mxu1 %v808_v57  ;;  %p777_p6 = pnand %p776_p5, %p770_p2 }
  0xc6   :  { %v128_v11 = vadd.s32 536870912, %v127_v10 }
  0xc8   :  { %v129_v12 = vshrl.u32 %v128_v11, 30  ;;  %659 = vmatpush3.bf16.msra.mxu1 %v711_v59 }
  0xc9   :  { %660 = vmatprep.subr.bf16.mxu1 %v808_v57 }
  0xca   :  { %v130_v13 = vshll.u32 %v129_v12, 30  ;;  %v153_v34 = vsub.s32 4, %v129_v12 }
  0xcc   :  { %v131_v14 = vsub.s32 %v127_v10, %v130_v13  ;;  %v154_v37 = vsel %vm69_vm7, %v153_v34, %v129_v12  ;;  %v614_v13 = vld [vmem:[%s920_s5] ss:$0 sm:$0xff] }
  0xcd   :  { %v156_v39 = vsel %vm68_vm8, 0, %v154_v37 }
  0xce   :  { %v133_v15 = vsub.s32 0, %v131_v14  ;;  %v264_v40 = vadd.s32 3, %v156_v39  ;;  %v160_v41 = vand.u32 3, %v156_v39 }
  0xd0   :  { %v589_v16 = vmin.u32 %v133_v15, %v131_v14  ;;  %v265_v42 = vand.u32 3, %v264_v40  ;;  %vm165_vm9 = vcmp.eq.s32.totalorder %v160_v41, 2  ;;  %vm162_vm11 = vcmp.eq.s32.totalorder %v160_v41, 0 }
  0xd1   :  { %vm161_vm13 = vcmp.lt.s32.totalorder %v160_v41, 2 }
  0xd2   :  { %v135_v17 = vclz %v589_v16  ;;  %vm270_vm10 = vcmp.eq.s32.totalorder %v265_v42, 2  ;;  %vm267_vm12 = vcmp.eq.s32.totalorder %v265_v42, 0  ;;  %vm266_vm14 = vcmp.lt.s32.totalorder %v265_v42, 2 }
  0xd4   :  { %v590_v18 = vadd.s32 4294967294, %v135_v17 }
  0xd6   :  { %vm591_vm6 = vcmp.lt.s32.totalorder %v590_v18, 0 }
  0xd7   :  { %v138_v19 = vsel %vm591_vm6, 0, %v590_v18 }
  0xd8   :  { %v139_v23 = vsub.s32 32, %v138_v19  ;;  %v143_v24 = vsub.s32 4294967266, %v138_v19  ;;  %v140_v25 = vshll.u32 %v131_v14, %v138_v19 }
  0xda   :  { %v141_v26 = vshrl.u32 %v123_v21, %v139_v23  ;;  %v144_v27 = vadd.s32 127, %v143_v24 }
  0xdc   :  { %v142_v28 = vor.u32 %v141_v26, %v140_v25  ;;  %v145_v29 = vshll.u32 %v144_v27, 23 }
  0xde   :  { %v146_v30 = vor.u32 4788187, %v145_v29  ;;  %v149_v32 = vcvt.s32.f32 %v142_v28 }
  0xe0   :  { %v147_v31 = vand.u32 2147483647, %v146_v30 }
  0xe2   :  { %v150_v33 = vmul.f32 %v149_v32, %v147_v31 }
  0xe4   :  { %v151_v35 = vxor.u32 2147483648, %v150_v33 }
  0xe6   :  { %v152_v36 = vsel %vm69_vm7, %v151_v35, %v150_v33 }
  0xe7   :  { %v155_v38 = vsel %vm68_vm8, %v876_v20, %v152_v36  ;;  %v712_v20 = vld [vmem:[#allocation5 + $0x18] sm:$0xff]  }
  0xe8   :  { %717 = vcosq.f32 %v155_v38  ;;  %661 = vmatpush3.bf16.msra.mxu1 %v712_v20 }
  0xe9   :  { %719 = vsinq.f32 %v155_v38  ;;  %662 = vmatprep.subr.bf16.mxu1 %v808_v57 }
  0xec   :  { %663 = vmatpush3.bf16.msra.mxu1 %v713_v60 }
  0xed   :  { %664 = vmatprep.subr.bf16.mxu1 %v808_v57 }
  0xf0   :  { %665 = vmatpush3.bf16.msra.mxu1 %v714_v61 }
  0xf1   :  { %666 = vmatprep.subr.bf16.mxu1 %v808_v57 }
  0xf2   :  { %v718_v43 = vpop.eup %717 }
  0xf3   :  { %v720_v44 = vpop.eup %719  ;;  %v166_v45 = vxor.u32 2147483648, %v718_v43 }
  0xf4   :  { %v163_v46 = vxor.u32 2147483648, %v720_v44  ;;  %667 = vmatpush3.bf16.msra.mxu1 %v715_v62 }
  0xf5   :  { %v167_v47 = vsel %vm165_vm9, %v166_v45, %v720_v44  ;;  %v272_v22 = vsel %vm270_vm10, %v166_v45, %v720_v44  ;;  %668 = vmatprep.subr.bf16.mxu1 %v808_v57 }
  0xf6   :  { %v164_v48 = vsel %vm162_vm11, %v718_v43, %v163_v46  ;;  %v269_v49 = vsel %vm267_vm12, %v718_v43, %v163_v46 }
  0xf7   :  { %v168_v50 = vsel %vm161_vm13, %v164_v48, %v167_v47  ;;  %v273_v51 = vsel %vm266_vm14, %v269_v49, %v272_v22 }
  0xf8   :  { %v169_v52 = vsel %vm159_vm15, nan, %v168_v50  ;;  %v274_v53 = vsel %vm159_vm15, nan, %v273_v51  ;;  %669 = vmatpush3.bf16.msra.mxu1 %v716_v63 }
  0xf9   :  { %v170_v54 = vpack.c.bf16 %v169_v52, %v169_v52  ;;  %v275_v55 = vpack.c.bf16 %v274_v53, %v274_v53 }
  0xfb   :  { %443 = vmatprep.mubr.bf16.mxu0 %v275_v55 }
  0xfc   :  { %444 = vmatmul.mubr.bf16.vlgmr.msra.gmra.mrb[0].mxu0 %v170_v54 }
 0x1cf   :  { %v639_v0 = vpop.f32.mrb[0].mxu0 }
 0x1d0   :  { %v640_v2 = vpop.f32.mrb[1].mxu0 }
 0x1d1   :  { %v641_v3 = vadd.f32 %v640_v2, %v639_v0  ;;  %v642_v4 = vpop.f32.mrb[2].mxu0 }
 0x1d2   :  { %v643_v5 = vpop.f32.mrb[3].mxu0 }
 0x1d3   :  { %v446_v6 = vadd.f32 %v641_v3, %v596_v1 }
 0x1d5   :  { %v613_v7 = vmul.f32 -1.442695, %v446_v6 }
 0x1d7   :  { %721 = vpow2.f32 %v613_v7 }
 0x1e1   :  { %v722_v8 = vpop.eup %721 }
 0x1e2   :  { %v454_v9 = vadd.f32 1.0, %v722_v8 }
 0x1e4   :  { %723 = vrcp.f32 %v454_v9 }
 0x1ee   :  { %v724_v10 = vpop.eup %723 }
 0x1ef   :  { %v457_v11 = vmul.f32 %v724_v10, %v446_v6 }
 0x1f1   :  { %v458_v12 = vpack.c.bf16 %v457_v11, %v457_v11 }
 0x1f3   :  { %671 = vmatmul.mubr.bf16.vlgmr.msra.gmra.mrb[0].mxu1 %v458_v12 }
 0x2c6   :  { %v564_v14 = vpop.f32.mrb[0].mxu1 }
 0x2c7   :  { %v565_v15 = vadd.f32 %v614_v13, %v564_v14  ;;  %v672_v16 = vpop.f32.mrb[1].mxu1 }
 0x2c8   :  { %v567_v17 = vpop.f32.mrb[2].mxu1 }
 0x2c9   :  { %570 = vst [vmem:[#allocation7] sm:$0xff] %v565_v15  ;;  %v673_v18 = vpop.f32.mrb[3].mxu1 }
 0x2ca   :  { %780 = shalt.err (!%p777_p6)
}
 0x2cb   :  { %s781_s5 = scalar_lea.hbm %s921_s6, 128 }
 0x2cc   :  { %p782_p7 = scmp.ne.s32.totalorder %s921_s6, %s781_s5  ;;  %p785_p8 = scmp.lt.u32.totalorder %s781_s5, %s921_s6 }
 0x2ce   :  { %p787_p9 = pnand %p785_p8, %p782_p7 }
 0x2d0   :  { %790 = shalt.err (!%p787_p9)
}
 0x2d1   :  { %580 = dma.vmem_to_hbm [thread:$0]  %s578_s3, 128, %s921_s6, [#allocation4]  }
 0x2d2   :  { %795 = dma.done.wait [#allocation4], 128  }
 0x2d3   :  { %796 = vsyncadd [#allocation4], 4294967168 }
 0x2d4   :  { %584 = vsyncpa [#allocation3], 1 }
 0x2d5   :  { %585 = vsyncpa [#allocation6], 1 }
 0x2d6   :  { %586 = vsyncpa [#allocation4], 1 }

// kernel: tpu_custom_call.1
= control target key start
LH: loop header
LB: loop body
LE: loop exit
PB: predicated region body
PF: predicated region fallthrough
CT: control target
= control target key end

     0   :  { %11 = vsyncpa [#allocation3], 0  ;;  %s915_s0 = inlined_call_operand.vmem [shape: f32[8,1], index: 0, kind: input, shape index: {}]   ;;  %s916_s1 = inlined_call_operand.vmem [shape: f32[1,128], index: 1, kind: input, shape index: {}]   ;;  %s917_s2 = inlined_call_operand.hbm [shape: bf16[256,128], index: 2, kind: input, shape index: {}]   ;;  %s918_s3 = inlined_call_operand.vmem [shape: f32[1,128], index: 3, kind: input, shape index: {}]   ;;  %s919_s4 = inlined_call_operand.hbm [shape: bf16[128,128], index: 4, kind: input, shape index: {}]   ;;  %s920_s5 = inlined_call_operand.vmem [shape: f32[1,128], index: 5, kind: input, shape index: {}]   ;;  %s921_s6 = inlined_call_operand.hbm [shape: f32[8,128], index: 6, kind: output, shape index: {}]  }
   0x1   :  { %12 = vsyncpa [#allocation6], 0 }
   0x2   :  { %13 = vsyncpa [#allocation4], 0  ;;  %s797_s21 = smov [#allocation2]   ;;  %s725_s25 = scalar_lea.hbm %s917_s2, 2048 }
   0x3   :  { %s23_s22 = sshll.u32 %s797_s21, 4  ;;  %p726_p0 = scmp.ne.s32.totalorder %s917_s2, %s725_s25  ;;  %s24_s22 = int_to_ptr.vmem [resolvable:$true] %s23_s22 }
   0x4   :  { %p729_p1 = scmp.lt.u32.totalorder %s725_s25, %s917_s2 }
   0x6   :  { %p731_p2 = pnand %p729_p1, %p726_p0 }
   0x8   :  { %734 = shalt.err (!%p731_p2)
}
   0x9   :  { %s735_s30 = scalar_lea.vmem %s24_s22, 2048  ;;  %p740_p4 = scmp.lt.s32.totalorder %s24_s22, %s24_s22 }
   0xa   :  { %p736_p3 = scmp.ne.s32.totalorder %s24_s22, %s735_s30  ;;  %p741_p5 = scmp.lt.s32.totalorder %s735_s30, %s735_s30 }
   0xc   :  { %p742_p6 = por %p741_p5, %p740_p4 }
   0xe   :  { %p743_p7 = pnand %p742_p6, %p736_p3 }
  0x10   :  { %746 = shalt.err (!%p743_p7)
}
  0x11   :  { %s798_s7 = smov 64   ;;  %s799_s8 = smov 4  }
  0x12   :  { %29 = dma.hbm_to_vmem [thread:$0]  %s917_s2, 2048, %s24_s22, [#allocation3], %s798_s7, %s798_s7, %s799_s8  }
  0x13   :  { %s800_s11 = smov [#allocation5]   ;;  %s747_s15 = scalar_lea.hbm %s919_s4, 1024 }
  0x14   :  { %s37_s12 = sshll.u32 %s800_s11, 4  ;;  %p748_p8 = scmp.ne.s32.totalorder %s919_s4, %s747_s15  ;;  %s38_s12 = int_to_ptr.vmem [resolvable:$true] %s37_s12 }
  0x15   :  { %p751_p9 = scmp.lt.u32.totalorder %s747_s15, %s919_s4 }
  0x17   :  { %p753_p10 = pnand %p751_p9, %p748_p8 }
  0x19   :  { %756 = shalt.err (!%p753_p10)
}
  0x1a   :  { %s757_s20 = scalar_lea.vmem %s38_s12, 1024  ;;  %p762_p12 = scmp.lt.s32.totalorder %s38_s12, %s38_s12 }
  0x1b   :  { %p758_p11 = scmp.ne.s32.totalorder %s38_s12, %s757_s20  ;;  %p763_p13 = scmp.lt.s32.totalorder %s757_s20, %s757_s20 }
  0x1d   :  { %p764_p0 = por %p763_p13, %p762_p12 }
  0x1f   :  { %p765_p1 = pnand %p764_p0, %p758_p11 }
  0x21   :  { %768 = shalt.err (!%p765_p1)
}
  0x22   :  { %43 = dma.hbm_to_vmem [thread:$0]  %s919_s4, 1024, %s38_s12, [#allocation6], %s798_s7, %s798_s7, %s799_s8  }
  0x23   :  { %791 = dma.done.wait [#allocation3], 2048  }
  0x24   :  { %792 = vsyncadd [#allocation3], 4294965248 }
  0x25   :  { %793 = dma.done.wait [#allocation6], 1024  }
  0x26   :  { %794 = vsyncadd [#allocation6], 4294966272  ;;  %v801_v0 = vmov 0   ;;  %v53_v1 = vld [vmem:[%s915_s0] sm:$0xff]  ;;  %v695_v4 = vld [vmem:[#allocation2 + $0x48] sm:$0xff]   ;;  %s810_s27 = smov [#allocation7]  }
  0x27   :  { %692 = vset.pattern.permute.xlu0 %v801_v0  ;;  %v693_v2 = vld [vmem:[#allocation2 + $0x40] sm:$0xff]   ;;  %v696_v5 = vld [vmem:[#allocation2 + $0x8] sm:$0xff]   ;;  %v697_v6 = vld [vmem:[#allocation2 + $0x50] sm:$0xff]   ;;  %v802_v32 = vmov 2102212464  }
  0x28   :  { %57 = vperm.xlu0 %692, %v53_v1   ;;  %v694_v3 = vld [vmem:[#allocation2] sm:$0xff]   ;;  %623 = vmatprep.subr.bf16.mxu0 %v693_v2  ;;  %v698_v7 = vld [vmem:[#allocation2 + $0x10] sm:$0xff]   ;;  %v699_v8 = vld [vmem:[#allocation2 + $0x58] sm:$0xff]   ;;  %v803_v34 = vmov 920167782  }
  0x29   :  { %624 = vmatpush3.bf16.msra.mxu0 %v694_v3  ;;  %v700_v9 = vld [vmem:[#allocation2 + $0x18] sm:$0xff]   ;;  %v701_v10 = vld [vmem:[#allocation2 + $0x60] sm:$0xff]   ;;  %v703_v12 = vld [vmem:[#allocation2 + $0x68] sm:$0xff]   ;;  %v804_v38 = vmov 1326507024  }
  0x2a   :  { %625 = vmatprep.subr.bf16.mxu0 %v695_v4  ;;  %v702_v11 = vld [vmem:[#allocation2 + $0x20] sm:$0xff]   ;;  %v704_v13 = vld [vmem:[#allocation2 + $0x28] sm:$0xff]   ;;  %v705_v14 = vld [vmem:[#allocation2 + $0x70] sm:$0xff]   ;;  %v805_v40 = vmov 683565275  }
  0x2b   :  { %v706_v15 = vld [vmem:[#allocation2 + $0x30] sm:$0xff]   ;;  %v707_v16 = vld [vmem:[#allocation2 + $0x78] sm:$0xff]   ;;  %v587_v18 = vld [vmem:[%s916_s1] ss:$0 sm:$0xff]  ;;  %v806_v42 = vmov 2475754826  }
  0x2c   :  { %v708_v17 = vld [vmem:[#allocation2 + $0x38] sm:$0xff]   ;;  %v807_v45 = vmov 2131351028  }
  0x2d   :  { %626 = vmatpush3.bf16.msra.mxu0 %v696_v5 }
  0x2e   :  { %627 = vmatprep.subr.bf16.mxu0 %v697_v6 }
  0x31   :  { %628 = vmatpush3.bf16.msra.mxu0 %v698_v7 }
  0x32   :  { %629 = vmatprep.subr.bf16.mxu0 %v699_v8 }
  0x35   :  { %630 = vmatpush3.bf16.msra.mxu0 %v700_v9 }
  0x36   :  { %631 = vmatprep.subr.bf16.mxu0 %v701_v10 }
  0x39   :  { %632 = vmatpush3.bf16.msra.mxu0 %v702_v11 }
  0x3a   :  { %633 = vmatprep.subr.bf16.mxu0 %v703_v12 }
  0x3d   :  { %634 = vmatpush3.bf16.msra.mxu0 %v704_v13 }
  0x3e   :  { %635 = vmatprep.subr.bf16.mxu0 %v705_v14 }
  0x41   :  { %636 = vmatpush3.bf16.msra.mxu0 %v706_v15 }
  0x42   :  { %637 = vmatprep.subr.bf16.mxu0 %v707_v16 }
  0x45   :  { %638 = vmatpush3.bf16.msra.mxu0 %v708_v17 }
  0xa7   :  { %v58_v19 = vpop.permute.xlu0 %57 }
  0xa8   :  { %v876_v20 = vmul.f32 %v587_v18, %v58_v19 }
  0xaa   :  { %v70_v21 = vand.u32 2139095040, %v876_v20  ;;  %v67_v22 = vand.u32 2147483647, %v876_v20  ;;  %vm69_vm7 = vcmp.lt.s32.totalorder %v876_v20, 0  ;;  %vm159_vm15 = vweird.f32 %v876_v20 }
  0xac   :  { %v71_v23 = vshrl.u32 %v70_v21, 23  ;;  %v74_v25 = vand.u32 8388607, %v67_v22  ;;  %vm68_vm8 = vcmp.le.f32.partialorder %v67_v22, 0.7853982 }
  0xae   :  { %v588_v24 = vadd.s32 4294967169, %v71_v23  ;;  %v75_v28 = vor.u32 8388608, %v74_v25 }
  0xb0   :  { %v77_v26 = vadd.s32 1, %v588_v24  ;;  %v115_v36 = vshll.u32 %v75_v28, 8 }
  0xb2   :  { %vm78_vm0 = vcmp.gt.s32.totalorder %v77_v26, 0 }
  0xb3   :  { %v79_v27 = vsel %vm78_vm0, %v77_v26, 0  ;;  %vm809_vm0 = vmmov 0  }
  0xb4   :  { %v81_v29 = vand.u32 31, %v79_v27  ;;  %v80_v30 = vshrl.u32 %v79_v27, 5 }
  0xb6   :  { %v82_v31 = vsub.s32 32, %v81_v29  ;;  %v93_v33 = vshll.u32 %v802_v32, %v81_v29  ;;  %v96_v35 = vshll.u32 %v803_v34, %v81_v29  ;;  %v84_v41 = vshll.u32 %v805_v40, %v81_v29 }
  0xb7   :  { %v87_v44 = vshll.u32 %v806_v42, %v81_v29  ;;  %v90_v47 = vshll.u32 %v807_v45, %v81_v29  ;;  %vm102_vm1 = vcmp.lt.s32.totalorder %v80_v30, 4  ;;  %vm99_vm2 = vcmp.lt.s32.totalorder %v80_v30, 1 }
  0xb8   :  { %v94_v37 = vshrl.u32 %v803_v34, %v82_v31  ;;  %v97_v39 = vshrl.u32 %v804_v38, %v82_v31  ;;  %v85_v43 = vshrl.u32 %v806_v42, %v82_v31  ;;  %v88_v46 = vshrl.u32 %v807_v45, %v82_v31 }
  0xb9   :  { %v91_v48 = vshrl.u32 %v802_v32, %v82_v31  ;;  %v83_v52 = vshrl.u32 %v805_v40, %v82_v31  ;;  %vm100_vm3 = vcmp.lt.s32.totalorder %v80_v30, 2  ;;  %vm101_vm4 = vcmp.lt.s32.totalorder %v80_v30, 3 }
  0xba   :  { %v95_v49 = vor.u32 %v94_v37, %v93_v33  ;;  %v98_v50 = vor.u32 %v97_v39, %v96_v35  ;;  %v86_v51 = vor.u32 %v85_v43, %v84_v41  ;;  %v89_v53 = vor.u32 %v88_v46, %v87_v44 }
  0xbb   :  { %v92_v54 = vor.u32 %v91_v48, %v90_v47 }
  0xbc   :  { %v108_v55 = vsel %vm102_vm1, %v95_v49, 920167782  ;;  %v112_v56 = vsel %vm102_vm1, %v98_v50, 1326507024  ;;  %v107_v58 = vsel %vm99_vm2, %v86_v51, %v89_v53  ;;  %v103_v61 = vsel %vm99_vm2, %v83_v52, %v86_v51 }
  0xbd   :  { %v104_v57 = vsel %vm102_vm1, %v92_v54, 2102212464  ;;  %v109_v59 = vsel %vm101_vm4, %v92_v54, %v108_v55  ;;  %v111_v60 = vsel %vm99_vm2, %v89_v53, %v92_v54  ;;  %v113_v0 = vsel %vm101_vm4, %v95_v49, %v112_v56  ;;  %v709_v56 = vld [vmem:[#allocation5] sm:$0xff]  }
  0xbe   :  { %v105_v62 = vsel %vm101_vm4, %v89_v53, %v104_v57  ;;  %v110_v63 = vsel %vm100_vm3, %v107_v58, %v109_v59  ;;  %v114_v1 = vsel %vm100_vm3, %v111_v60, %v113_v0  ;;  %v808_v57 = vmov 0.0   ;;  %v710_v58 = vld [vmem:[#allocation5 + $0x8] sm:$0xff]   ;;  %v711_v59 = vld [vmem:[#allocation5 + $0x10] sm:$0xff]   ;;  %v713_v60 = vld [vmem:[#allocation5 + $0x20] sm:$0xff]  }
  0xbf   :  { %v882_v2 = vmul.u32.u64.low %v115_v36, %v110_v63  ;;  %v883_v3 = vmul.u32.u64.high %v115_v36, %v110_v63, %v882_v2  ;;  %v885_v4 = vmul.u32.u64.low %v115_v36, %v114_v1  ;;  %v886_v5 = vmul.u32.u64.high %v115_v36, %v114_v1, %v885_v4  ;;  %654 = vmatprep.subr.bf16.mxu1 %v808_v57  ;;  %670 = vmatprep.mubr.msk.bf16.mxu1 %vm809_vm0, %v808_v57  ;;  %v716_v63 = vld [vmem:[#allocation5 + $0x38] sm:$0xff]   ;;  %v596_v1 = vld [vmem:[%s918_s3] ss:$0 sm:$0xff]  ;;  %s577_s3 = sshll.u32 %s810_s27, 4  ;;  %s578_s3 = int_to_ptr.vmem [resolvable:$true] %s577_s3 }
  0xc0   :  { %v106_v6 = vsel %vm100_vm3, %v103_v61, %v105_v62  ;;  %655 = vmatpush3.bf16.msra.mxu1 %v709_v56  ;;  %v714_v61 = vld [vmem:[#allocation5 + $0x28] sm:$0xff]   ;;  %v715_v62 = vld [vmem:[#allocation5 + $0x30] sm:$0xff]   ;;  %s769_s28 = scalar_lea.vmem %s578_s3, 128  ;;  %p774_p3 = scmp.lt.s32.totalorder %s578_s3, %s578_s3 }
  0xc1   :  { %v125_v7 = vadd.s32 1, %v883_v3  ;;  %v122_v8 = vmul.u32 %v115_v36, %v106_v6  ;;  %vm124_vm5 = vc.u32 %v886_v5, %v882_v2  ;;  %v123_v21 = vadd.s32 %v882_v2, %v886_v5  ;;  %656 = vmatprep.subr.bf16.mxu1 %v808_v57  ;;  %p770_p2 = scmp.ne.s32.totalorder %s578_s3, %s769_s28  ;;  %p775_p4 = scmp.lt.s32.totalorder %s769_s28, %s769_s28 }
  0xc3   :  { %v126_v9 = vsel %vm124_vm5, %v125_v7, %v883_v3  ;;  %p776_p5 = por %p775_p4, %p774_p3 }
  0xc4   :  { %v127_v10 = vadd.s32 %v126_v9, %v122_v8  ;;  %657 = vmatpush3.bf16.msra.mxu1 %v710_v58 }
  0xc5   :  { %658 = vmatprep.subr.bf16.mxu1 %v808_v57  ;;  %p777_p6 = pnand %p776_p5, %p770_p2 }
  0xc6   :  { %v128_v11 = vadd.s32 536870912, %v127_v10 }
  0xc8   :  { %v129_v12 = vshrl.u32 %v128_v11, 30  ;;  %659 = vmatpush3.bf16.msra.mxu1 %v711_v59 }
  0xc9   :  { %660 = vmatprep.subr.bf16.mxu1 %v808_v57 }
  0xca   :  { %v130_v13 = vshll.u32 %v129_v12, 30  ;;  %v153_v34 = vsub.s32 4, %v129_v12 }
  0xcc   :  { %v131_v14 = vsub.s32 %v127_v10, %v130_v13  ;;  %v154_v37 = vsel %vm69_vm7, %v153_v34, %v129_v12  ;;  %v614_v13 = vld [vmem:[%s920_s5] ss:$0 sm:$0xff] }
  0xcd   :  { %v156_v39 = vsel %vm68_vm8, 0, %v154_v37 }
  0xce   :  { %v133_v15 = vsub.s32 0, %v131_v14  ;;  %v264_v40 = vadd.s32 3, %v156_v39  ;;  %v160_v41 = vand.u32 3, %v156_v39 }
  0xd0   :  { %v589_v16 = vmin.u32 %v133_v15, %v131_v14  ;;  %v265_v42 = vand.u32 3, %v264_v40  ;;  %vm165_vm9 = vcmp.eq.s32.totalorder %v160_v41, 2  ;;  %vm162_vm11 = vcmp.eq.s32.totalorder %v160_v41, 0 }
  0xd1   :  { %vm161_vm13 = vcmp.lt.s32.totalorder %v160_v41, 2 }
  0xd2   :  { %v135_v17 = vclz %v589_v16  ;;  %vm270_vm10 = vcmp.eq.s32.totalorder %v265_v42, 2  ;;  %vm267_vm12 = vcmp.eq.s32.totalorder %v265_v42, 0  ;;  %vm266_vm14 = vcmp.lt.s32.totalorder %v265_v42, 2 }
  0xd4   :  { %v590_v18 = vadd.s32 4294967294, %v135_v17 }
  0xd6   :  { %vm591_vm6 = vcmp.lt.s32.totalorder %v590_v18, 0 }
  0xd7   :  { %v138_v19 = vsel %vm591_vm6, 0, %v590_v18 }
  0xd8   :  { %v139_v23 = vsub.s32 32, %v138_v19  ;;  %v143_v24 = vsub.s32 4294967266, %v138_v19  ;;  %v140_v25 = vshll.u32 %v131_v14, %v138_v19 }
  0xda   :  { %v141_v26 = vshrl.u32 %v123_v21, %v139_v23  ;;  %v144_v27 = vadd.s32 127, %v143_v24 }
  0xdc   :  { %v142_v28 = vor.u32 %v141_v26, %v140_v25  ;;  %v145_v29 = vshll.u32 %v144_v27, 23 }
  0xde   :  { %v146_v30 = vor.u32 4788187, %v145_v29  ;;  %v149_v32 = vcvt.s32.f32 %v142_v28 }
  0xe0   :  { %v147_v31 = vand.u32 2147483647, %v146_v30 }
  0xe2   :  { %v150_v33 = vmul.f32 %v149_v32, %v147_v31 }
  0xe4   :  { %v151_v35 = vxor.u32 2147483648, %v150_v33 }
  0xe6   :  { %v152_v36 = vsel %vm69_vm7, %v151_v35, %v150_v33 }
  0xe7   :  { %v155_v38 = vsel %vm68_vm8, %v876_v20, %v152_v36  ;;  %v712_v20 = vld [vmem:[#allocation5 + $0x18] sm:$0xff]  }
  0xe8   :  { %717 = vcosq.f32 %v155_v38  ;;  %661 = vmatpush3.bf16.msra.mxu1 %v712_v20 }
  0xe9   :  { %719 = vsinq.f32 %v155_v38  ;;  %662 = vmatprep.subr.bf16.mxu1 %v808_v57 }
  0xec   :  { %663 = vmatpush3.bf16.msra.mxu1 %v713_v60 }
  0xed   :  { %664 = vmatprep.subr.bf16.mxu1 %v808_v57 }
  0xf0   :  { %665 = vmatpush3.bf16.msra.mxu1 %v714_v61 }
  0xf1   :  { %666 = vmatprep.subr.bf16.mxu1 %v808_v57 }
  0xf2   :  { %v718_v43 = vpop.eup %717 }
  0xf3   :  { %v720_v44 = vpop.eup %719  ;;  %v166_v45 = vxor.u32 2147483648, %v718_v43 }
  0xf4   :  { %v163_v46 = vxor.u32 2147483648, %v720_v44  ;;  %667 = vmatpush3.bf16.msra.mxu1 %v715_v62 }
  0xf5   :  { %v167_v47 = vsel %vm165_vm9, %v166_v45, %v720_v44  ;;  %v272_v22 = vsel %vm270_vm10, %v166_v45, %v720_v44  ;;  %668 = vmatprep.subr.bf16.mxu1 %v808_v57 }
  0xf6   :  { %v164_v48 = vsel %vm162_vm11, %v718_v43, %v163_v46  ;;  %v269_v49 = vsel %vm267_vm12, %v718_v43, %v163_v46 }
  0xf7   :  { %v168_v50 = vsel %vm161_vm13, %v164_v48, %v167_v47  ;;  %v273_v51 = vsel %vm266_vm14, %v269_v49, %v272_v22 }
  0xf8   :  { %v169_v52 = vsel %vm159_vm15, nan, %v168_v50  ;;  %v274_v53 = vsel %vm159_vm15, nan, %v273_v51  ;;  %669 = vmatpush3.bf16.msra.mxu1 %v716_v63 }
  0xf9   :  { %v170_v54 = vpack.c.bf16 %v169_v52, %v169_v52  ;;  %v275_v55 = vpack.c.bf16 %v274_v53, %v274_v53 }
  0xfb   :  { %443 = vmatprep.mubr.bf16.mxu0 %v275_v55 }
  0xfc   :  { %444 = vmatmul.mubr.bf16.vlgmr.msra.gmra.mrb[0].mxu0 %v170_v54 }
 0x1cf   :  { %v639_v0 = vpop.f32.mrb[0].mxu0 }
 0x1d0   :  { %v640_v2 = vpop.f32.mrb[1].mxu0 }
 0x1d1   :  { %v641_v3 = vadd.f32 %v640_v2, %v639_v0  ;;  %v642_v4 = vpop.f32.mrb[2].mxu0 }
 0x1d2   :  { %v643_v5 = vpop.f32.mrb[3].mxu0 }
 0x1d3   :  { %v446_v6 = vadd.f32 %v641_v3, %v596_v1 }
 0x1d5   :  { %v613_v7 = vmul.f32 -1.442695, %v446_v6 }
 0x1d7   :  { %721 = vpow2.f32 %v613_v7 }
 0x1e1   :  { %v722_v8 = vpop.eup %721 }
 0x1e2   :  { %v454_v9 = vadd.f32 1.0, %v722_v8 }
 0x1e4   :  { %723 = vrcp.f32 %v454_v9 }
 0x1ee   :  { %v724_v10 = vpop.eup %723 }
 0x1ef   :  { %v457_v11 = vmul.f32 %v724_v10, %v446_v6 }
 0x1f1   :  { %v458_v12 = vpack.c.bf16 %v457_v11, %v457_v11 }
 0x1f3   :  { %671 = vmatmul.mubr.bf16.vlgmr.msra.gmra.mrb[0].mxu1 %v458_v12 }
 0x2c6   :  { %v564_v14 = vpop.f32.mrb[0].mxu1 }
 0x2c7   :  { %v565_v15 = vadd.f32 %v614_v13, %v564_v14  ;;  %v672_v16 = vpop.f32.mrb[1].mxu1 }
 0x2c8   :  { %v567_v17 = vpop.f32.mrb[2].mxu1 }
 0x2c9   :  { %570 = vst [vmem:[#allocation7] sm:$0xff] %v565_v15  ;;  %v673_v18 = vpop.f32.mrb[3].mxu1 }
 0x2ca   :  { %780 = shalt.err (!%p777_p6)
}
 0x2cb   :  { %s781_s5 = scalar_lea.hbm %s921_s6, 128 }
 0x2cc   :  { %p782_p7 = scmp.ne.s32.totalorder %s921_s6, %s781_s5  ;;  %p785_p8 = scmp.lt.u32.totalorder %s781_s5, %s921_s6 }
 0x2ce   :  { %p787_p9 = pnand %p785_p8, %p782_p7 }
 0x2d0   :  { %790 = shalt.err (!%p787_p9)
}
 0x2d1   :  { %580 = dma.vmem_to_hbm [thread:$0]  %s578_s3, 128, %s921_s6, [#allocation4]  }
 0x2d2   :  { %795 = dma.done.wait [#allocation4], 128  }
 0x2d3   :  { %796 = vsyncadd [#allocation4], 4294967168 }
 0x2d4   :  { %584 = vsyncpa [#allocation3], 1 }
 0x2d5   :  { %585 = vsyncpa [#allocation6], 1 }
 0x2d6   :  { %586 = vsyncpa [#allocation4], 1 }

</bundles_post_ra>
